<compile_context>
chip_gen: v6e
topology: v6e:2x2x1
jax: 0.10.0
libtpu: 0.0.40
codegen_flags: <defaults>
</compile_context>

<pallas_src>
import math
from functools import lru_cache, partial

import jax
import jax.numpy as jnp
from jax.experimental import pallas as pl
from jax.experimental.pallas import tpu as pltpu

LRELU_SLOPE = 0.1

PERIODS = [2, 3, 5, 7, 11, 17, 23, 37]

S_CFG = [  # (cin, cout, kernel, stride, groups, pad)
    (1, 16, 15, 1, 1, 7),
    (16, 64, 41, 4, 4, 20),
    (64, 256, 41, 4, 16, 20),
    (256, 1024, 41, 4, 64, 20),
    (1024, 1024, 41, 4, 256, 20),
    (1024, 1024, 5, 1, 1, 2),
]
S_POST = (1024, 1, 3, 1, 1, 1)

P_CFG = [  # (cin, cout, kernel, stride)   padding = (kernel-1)//2
    (1, 32, 5, 3),
    (32, 128, 5, 3),
    (128, 512, 5, 3),
    (512, 1024, 5, 3),
    (1024, 1024, 5, 1),
]
P_POST = (1024, 1, 3, 1)


# ---------------------------------------------------------------------------
# Pallas kernel: grouped matmul + bias + (optional) leaky-relu
# ---------------------------------------------------------------------------
def _mm_bias_act_kernel(p_ref, w_ref, b_ref, o_ref, acc_ref, *, slope):
    # p_ref: (1, tm, tk)  w_ref: (1, tk, tn)  b_ref: (1, 1, tn)  o_ref: (1, tm, tn)
    @pl.when(pl.program_id(3) == 0)
    def _init():
        acc_ref[...] = jnp.zeros_like(acc_ref)

    acc_ref[...] += jnp.dot(p_ref[0], w_ref[0],
                            preferred_element_type=jnp.float32)

    @pl.when(pl.program_id(3) == pl.num_programs(3) - 1)
    def _fin():
        y = acc_ref[...] + b_ref[0]
        if slope is not None:
            y = jnp.where(y >= 0.0, y, y * slope)
        o_ref[0] = y.astype(o_ref.dtype)


@lru_cache(maxsize=None)
def _make_gmm(G, Mp, Kp, Np, tm, tn, tk, slope):
    kern = partial(_mm_bias_act_kernel, slope=slope)
    fn = pl.pallas_call(
        kern,
        out_shape=jax.ShapeDtypeStruct((G, Mp, Np), jnp.float32),
        grid_spec=pltpu.PrefetchScalarGridSpec(
            num_scalar_prefetch=0,
            grid=(G, Mp // tm, Np // tn, Kp // tk),
            in_specs=[
                pl.BlockSpec((1, tm, tk), lambda g, i, j, k: (g, i, k)),
                pl.BlockSpec((1, tk, tn), lambda g, i, j, k: (g, k, j)),
                pl.BlockSpec((1, 1, tn), lambda g, i, j, k: (g, 0, j)),
            ],
            out_specs=pl.BlockSpec((1, tm, tn), lambda g, i, j, k: (g, i, j)),
            scratch_shapes=[pltpu.VMEM((tm, tn), jnp.float32)],
        ),
        compiler_params=pltpu.CompilerParams(
            dimension_semantics=("parallel", "parallel", "parallel",
                                 "arbitrary")),
    )
    return jax.jit(fn)


def _round_up(x, m):
    return ((x + m - 1) // m) * m


def grouped_matmul_bias_act(patches, weight, bias, slope):
    """patches (G, M, K) @ weight (G, K, N) + bias (G, N); optional leaky-relu."""
    G, M, K = patches.shape
    N = weight.shape[2]
    tm = tn = 128
    Mp = _round_up(M, tm)
    Np = _round_up(N, tn)
    Kp = _round_up(K, 128)
    tk = 512 if Kp % 512 == 0 else 128
    p = jnp.pad(patches.astype(jnp.float32), ((0, 0), (0, Mp - M), (0, Kp - K)))
    w = jnp.pad(weight.astype(jnp.float32), ((0, 0), (0, Kp - K), (0, Np - N)))
    b = jnp.pad(bias.astype(jnp.float32).reshape(G, 1, N),
                ((0, 0), (0, 0), (0, Np - N)))
    out = _make_gmm(G, Mp, Kp, Np, tm, tn, tk, slope)(p, w, b)
    return out[:, :M, :N]


# ---------------------------------------------------------------------------
# Conv layers as im2col + fused Pallas matmul
# ---------------------------------------------------------------------------
def conv1d(x, w, b, *, stride, padding, groups=1, slope=None):
    """torch.nn.Conv1d semantics (grouped). x: (B, Cin, L), w: (Cout, Cin/G, k)."""
    B, Cin, L = x.shape
    Cout, Cin_g, k = w.shape
    G = groups
    Cout_g = Cout // G
    L_out = (L + 2 * padding - k) // stride + 1
    xpad = jnp.pad(x, ((0, 0), (0, 0), (padding, padding)))
    cols = [xpad[:, :, dk: dk + stride * (L_out - 1) + 1: stride]
            for dk in range(k)]
    pat = jnp.stack(cols, axis=-1)                       # (B, Cin, L_out, k)
    pat = pat.reshape(B, G, Cin_g, L_out, k)
    pat = pat.transpose(1, 0, 3, 2, 4).reshape(G, B * L_out, Cin_g * k)
    wm = w.reshape(G, Cout_g, Cin_g * k).transpose(0, 2, 1)   # (G, Cin_g*k, Cout_g)
    bm = b.reshape(G, Cout_g)
    out = grouped_matmul_bias_act(pat, wm, bm, slope)    # (G, B*L_out, Cout_g)
    out = out.reshape(G, B, L_out, Cout_g).transpose(1, 0, 3, 2)
    return out.reshape(B, Cout, L_out)


def conv2d_k1(x, w, b, *, stride, padding, slope=None):
    """torch Conv2d with kernel (k,1), stride (s,1), padding (p,0).
       x: (B, Cin, T, P), w: (Cout, Cin, k, 1)."""
    B, Cin, T, P = x.shape
    Cout, _, k, _ = w.shape
    T_out = (T + 2 * padding - k) // stride + 1
    xpad = jnp.pad(x, ((0, 0), (0, 0), (padding, padding), (0, 0)))
    cols = [xpad[:, :, dk: dk + stride * (T_out - 1) + 1: stride, :]
            for dk in range(k)]
    pat = jnp.stack(cols, axis=-1)                       # (B, Cin, T_out, P, k)
    pat = pat.transpose(0, 2, 3, 1, 4).reshape(1, B * T_out * P, Cin * k)
    wm = w.reshape(1, Cout, Cin * k).transpose(0, 2, 1)  # (1, Cin*k, Cout)
    bm = b.reshape(1, Cout)
    out = grouped_matmul_bias_act(pat, wm, bm, slope)    # (1, B*T_out*P, Cout)
    return out.reshape(B, T_out, P, Cout).transpose(0, 3, 1, 2)


# ---------------------------------------------------------------------------
# Discriminator forwards
# ---------------------------------------------------------------------------
def disc_s_forward(params, x):
    fmap = []
    for layer in params['convs']:
        x = conv1d(x, layer['w'], layer['b'], stride=layer['stride'],
                   padding=layer['pad'], groups=layer['groups'],
                   slope=LRELU_SLOPE)
        fmap.append(x)
    post = params['post']
    x = conv1d(x, post['w'], post['b'], stride=post['stride'],
               padding=post['pad'], groups=post['groups'], slope=None)
    fmap.append(x)
    x = x.reshape(x.shape[0], -1)
    return x, fmap


def disc_p_forward(params, x):
    period = params['period']
    fmap = []
    B, C, T = x.shape
    if T % period != 0:
        n_pad = period - (T % period)
        x = jnp.pad(x, ((0, 0), (0, 0), (0, n_pad)), mode='reflect')
        T = T + n_pad
    x = x.reshape(B, C, T // period, period)
    for layer in params['convs']:
        x = conv2d_k1(x, layer['w'], layer['b'], stride=layer['stride'],
                      padding=layer['pad'], slope=LRELU_SLOPE)
        fmap.append(x)
    post = params['post']
    x = conv2d_k1(x, post['w'], post['b'], stride=post['stride'],
                  padding=post['pad'], slope=None)
    fmap.append(x)
    x = x.reshape(B, -1)
    return x, fmap


def mpd_forward(params, y, y_hat):
    y_d_rs, y_d_gs, fmap_rs, fmap_gs = [], [], [], []
    for d in params:
        fwd = disc_s_forward if d['type'] == 's' else disc_p_forward
        y_d_r, fmap_r = fwd(d, y)
        y_d_g, fmap_g = fwd(d, y_hat)
        y_d_rs.append(y_d_r)
        y_d_gs.append(y_d_g)
        fmap_rs.append(fmap_r)
        fmap_gs.append(fmap_g)
    return y_d_rs, y_d_gs, fmap_rs, fmap_gs


# ---------------------------------------------------------------------------
# Parameter construction (weight_norm applied once: W = g * v / ||v||)
# ---------------------------------------------------------------------------
def _init_conv(key, shape, fan_in):
    kv, kg, kb = jax.random.split(key, 3)
    bound = 1.0 / math.sqrt(fan_in)
    v = jax.random.uniform(kv, shape, jnp.float32, -bound, bound)
    g = jax.random.uniform(kg, (shape[0],) + (1,) * (len(shape) - 1),
                           jnp.float32, 0.5, 1.5)
    norm = jnp.sqrt(jnp.sum(v * v, axis=tuple(range(1, v.ndim)),
                            keepdims=True)) + 1e-12
    w = g * v / norm
    b = jax.random.uniform(kb, (shape[0],), jnp.float32, -bound, bound)
    return w, b


def init_mpd_params(key):
    discs = []
    # DiscriminatorS
    convs = []
    for (cin, cout, k, stride, groups, pad) in S_CFG:
        key, sub = jax.random.split(key)
        w, b = _init_conv(sub, (cout, cin // groups, k), (cin // groups) * k)
        convs.append(dict(w=w, b=b, stride=stride, groups=groups, pad=pad))
    cin, cout, k, stride, groups, pad = S_POST
    key, sub = jax.random.split(key)
    wp, bp = _init_conv(sub, (cout, cin // groups, k), (cin // groups) * k)
    discs.append(dict(type='s', convs=convs,
                      post=dict(w=wp, b=bp, stride=stride, groups=groups,
                                pad=pad)))
    # DiscriminatorP, one per period
    for period in PERIODS:
        convs = []
        for (cin, cout, k, stride) in P_CFG:
            key, sub = jax.random.split(key)
            w, b = _init_conv(sub, (cout, cin, k, 1), cin * k)
            convs.append(dict(w=w, b=b, stride=stride, pad=(k - 1) // 2))
        cin, cout, k, stride = P_POST
        key, sub = jax.random.split(key)
        wp, bp = _init_conv(sub, (cout, cin, k, 1), cin * k)
        discs.append(dict(type='p', period=period, convs=convs,
                          post=dict(w=wp, b=bp, stride=stride,
                                    pad=(k - 1) // 2)))
    return discs


# ---------------------------------------------------------------------------
if __name__ == "__main__":
    key = jax.random.PRNGKey(0)
    key, kparams, ky, kg = jax.random.split(key, 4)

    params = init_mpd_params(kparams)

    B, T = 2, 256   # small demo sizes; channel widths are fixed by the module
    y = 0.1 * jax.random.normal(ky, (B, 1, T), dtype=jnp.float32)
    y_hat = 0.1 * jax.random.normal(kg, (B, 1, T), dtype=jnp.float32)

    y_d_rs, y_d_gs, fmap_rs, fmap_gs = mpd_forward(params, y, y_hat)
    y_d_rs, y_d_gs, fmap_rs, fmap_gs = jax.block_until_ready(
        (y_d_rs, y_d_gs, fmap_rs, fmap_gs))

    assert len(y_d_rs) == len(y_d_gs) == len(fmap_rs) == len(fmap_gs) == 9
    assert len(fmap_rs[0]) == 7                      # DiscriminatorS: 6 convs + post
    assert all(len(f) == 6 for f in fmap_rs[1:])     # DiscriminatorP: 5 convs + post
    for out in list(y_d_rs) + list(y_d_gs):
        assert out.shape[0] == B
        assert bool(jnp.all(jnp.isfinite(out)))
    print("KERNEL_OK")
</pallas_src>

<mosaic_0001>
module attributes {stable_mosaic.version = 11 : i64} {
  func.func @_mm_bias_act_kernel(%arg0: i32, %arg1: i32, %arg2: i32, %arg3: i32, %arg4: memref<1x128x128xf32, #tpu.memory_space<vmem>>, %arg5: memref<1x128x128xf32, #tpu.memory_space<vmem>>, %arg6: memref<1x1x128xf32, #tpu.memory_space<vmem>>, %arg7: memref<1x128x128xf32, #tpu.memory_space<vmem>>, %arg8: memref<128x128xf32, #tpu.memory_space<vmem>>) attributes {dimension_semantics = [#tpu.dimension_semantics<parallel>, #tpu.dimension_semantics<parallel>, #tpu.dimension_semantics<parallel>, #tpu.dimension_semantics<arbitrary>], iteration_bounds = array<i64: 1, 4, 1, 1>, scalar_prefetch = 0 : i64, scratch_operands = 1 : i64, tpu.core_type = #tpu.core_type<tc>, window_params = [{transform_indices = @transform_0, window_bounds = array<i64: 1, 128, 128>}, {transform_indices = @transform_1, window_bounds = array<i64: 1, 128, 128>}, {transform_indices = @transform_2, window_bounds = array<i64: 1, 1, 128>}, {transform_indices = @transform_3, window_bounds = array<i64: 1, 128, 128>}]} {
    %c0_i32 = arith.constant 0 : i32
    %0 = arith.cmpi eq, %arg3, %c0_i32 : i32
    %1 = arith.extui %0 : i1 to i32
    %c0_i32_0 = arith.constant 0 : i32
    %2 = arith.cmpi ne, %1, %c0_i32_0 : i32
    scf.if %2 {
      %cst_12 = arith.constant 0.000000e+00 : f32
      %14 = vector.broadcast %cst_12 : f32 to vector<128x128xf32>
      %c0_13 = arith.constant 0 : index
      %c0_14 = arith.constant 0 : index
      %15 = vector.load %arg8[%c0_13, %c0_14] : memref<128x128xf32, #tpu.memory_space<vmem>>, vector<128x128xf32>
      tpu.vector_store %arg8[%c0_13, %c0_14], %14 {strides = array<i32>} : memref<128x128xf32, #tpu.memory_space<vmem>>, vector<128x128xf32>,
    } else {
    }
    %c0 = arith.constant 0 : index
    %c0_1 = arith.constant 0 : index
    %3 = vector.load %arg8[%c0, %c0_1] : memref<128x128xf32, #tpu.memory_space<vmem>>, vector<128x128xf32>
    %c0_2 = arith.constant 0 : index
    %c0_3 = arith.constant 0 : index
    %c0_4 = arith.constant 0 : index
    %4 = vector.load %arg4[%c0_2, %c0_3, %c0_4] : memref<1x128x128xf32, #tpu.memory_space<vmem>>, vector<1x128x128xf32>
    %5 = vector.shape_cast %4 : vector<1x128x128xf32> to vector<128x128xf32>
    %c0_5 = arith.constant 0 : index
    %c0_6 = arith.constant 0 : index
    %c0_7 = arith.constant 0 : index
    %6 = vector.load %arg5[%c0_5, %c0_6, %c0_7] : memref<1x128x128xf32, #tpu.memory_space<vmem>>, vector<1x128x128xf32>
    %7 = vector.shape_cast %6 : vector<1x128x128xf32> to vector<128x128xf32>
    %cst = arith.constant dense<0.000000e+00> : vector<128x128xf32>
    %8 = tpu.matmul %5, %7, %cst {dimension_numbers = #tpu.dot_dimension_numbers<[1], [0], [0], [1], [0, 0, 1, 1], [], []>} : vector<128x128xf32>, vector<128x128xf32>, vector<128x128xf32> -> vector<128x128xf32>
    %9 = arith.addf %3, %8 : vector<128x128xf32>
    %c0_8 = arith.constant 0 : index
    %c0_9 = arith.constant 0 : index
    %10 = vector.load %arg8[%c0_8, %c0_9] : memref<128x128xf32, #tpu.memory_space<vmem>>, vector<128x128xf32>
    tpu.vector_store %arg8[%c0_8, %c0_9], %9 {strides = array<i32>} : memref<128x128xf32, #tpu.memory_space<vmem>>, vector<128x128xf32>,
    %c0_i32_10 = arith.constant 0 : i32
    %11 = arith.cmpi eq, %arg3, %c0_i32_10 : i32
    %12 = arith.extui %11 : i1 to i32
    %c0_i32_11 = arith.constant 0 : i32
    %13 = arith.cmpi ne, %12, %c0_i32_11 : i32
    scf.if %13 {
      %c0_12 = arith.constant 0 : index
      %c0_13 = arith.constant 0 : index
      %14 = vector.load %arg8[%c0_12, %c0_13] : memref<128x128xf32, #tpu.memory_space<vmem>>, vector<128x128xf32>
      %c0_14 = arith.constant 0 : index
      %c0_15 = arith.constant 0 : index
      %c0_16 = arith.constant 0 : index
      %15 = vector.load %arg6[%c0_14, %c0_15, %c0_16] : memref<1x1x128xf32, #tpu.memory_space<vmem>>, vector<1x1x128xf32>
      %16 = vector.shape_cast %15 : vector<1x1x128xf32> to vector<1x128xf32>
      %17 = vector.broadcast %16 : vector<1x128xf32> to vector<128x128xf32>
      %18 = arith.addf %14, %17 : vector<128x128xf32>
      %cst_17 = arith.constant 0.000000e+00 : f32
      %19 = vector.broadcast %cst_17 : f32 to vector<128x128xf32>
      %20 = arith.cmpf oge, %18, %19 : vector<128x128xf32>
      %cst_18 = arith.constant 1.000000e-01 : f32
      %21 = vector.broadcast %cst_18 : f32 to vector<128x128xf32>
      %22 = arith.mulf %18, %21 : vector<128x128xf32>
      %23 = arith.select %20, %18, %22 : vector<128x128xi1>, vector<128x128xf32>
      %c0_19 = arith.constant 0 : index
      %c0_20 = arith.constant 0 : index
      %c0_21 = arith.constant 0 : index
      %24 = vector.load %arg7[%c0_19, %c0_20, %c0_21] : memref<1x128x128xf32, #tpu.memory_space<vmem>>, vector<1x128x128xf32>
      %25 = vector.shape_cast %24 : vector<1x128x128xf32> to vector<128x128xf32>
      %26 = vector.shape_cast %23 : vector<128x128xf32> to vector<1x128x128xf32>
      tpu.vector_store %arg7[%c0_19, %c0_20, %c0_21], %26 {strides = array<i32>} : memref<1x128x128xf32, #tpu.memory_space<vmem>>, vector<1x128x128xf32>,
    } else {
    }
    return
  }
  func.func @transform_0(%arg0: i32, %arg1: i32, %arg2: i32, %arg3: i32) -> (i32, i32, i32) {
    %c0_i32 = arith.constant 0 : i32
    return %arg0, %arg1, %arg3 : i32, i32, i32
  }
  func.func @transform_1(%arg0: i32, %arg1: i32, %arg2: i32, %arg3: i32) -> (i32, i32, i32) {
    %c0_i32 = arith.constant 0 : i32
    return %arg0, %arg3, %arg2 : i32, i32, i32
  }
  func.func @transform_2(%arg0: i32, %arg1: i32, %arg2: i32, %arg3: i32) -> (i32, i32, i32) {
    %c0_i32 = arith.constant 0 : i32
    %c0_i32_0 = arith.constant 0 : i32
    return %arg0, %c0_i32, %arg2 : i32, i32, i32
  }
  func.func @transform_3(%arg0: i32, %arg1: i32, %arg2: i32, %arg3: i32) -> (i32, i32, i32) {
    %c0_i32 = arith.constant 0 : i32
    return %arg0, %arg1, %arg2 : i32, i32, i32
  }
}

</mosaic_0001>

<bundles_post_ra>
// kernel: tpu_custom_call.1
= control target key start
LH: loop header
LB: loop body
LE: loop exit
PB: predicated region body
PF: predicated region fallthrough
CT: control target
= control target key end

     0   :  { %8 = vsyncpa [#allocation4], 0  ;;  %s1410_s0 = inlined_call_operand.hbm [shape: f32[1,512,128], index: 0, kind: input, shape index: {}]   ;;  %s1411_s1 = inlined_call_operand.hbm [shape: f32[1,128,128], index: 1, kind: input, shape index: {}]   ;;  %s1412_s2 = inlined_call_operand.vmem [shape: f32[1,1,128], index: 2, kind: input, shape index: {}]   ;;  %s1413_s3 = inlined_call_operand.hbm [shape: f32[1,512,128], index: 3, kind: output, shape index: {}]  }
   0x1   :  { %10 = vsyncpa [#allocation4 + $0x1], 0 }
   0x2   :  { %11 = vsyncpa [#allocation7], 0 }
   0x3   :  { %12 = vsyncpa [#allocation5], 0 }
   0x4   :  { %14 = vsyncpa [#allocation5 + $0x1], 0  ;;  %s1163_s12 = smov 0   ;;  %s1165_s13 = smov 0  }
   0x5   :  { %s1167_s14 = smov 0   ;;  %s1169_s15 = smov 0  }
   0x6   :  { %s1171_s16 = smov 0   ;;  %s1173_s17 = smov 0  }
   0x7 LB: > { %s778_s18 = sadd.s32 4294967295, %s1134_s17   ;;  %s779_s19 = sadd.s32 4294967294, %s1134_s17   ;;  %s1134_s17 = sphi %s1173_s17, %s20_s17   ;;  %s1130_s16 = sphi %s1171_s16, %s1434_s16   ;;  %s1126_s15 = sphi %s1169_s15, %s1433_s15   ;;  %s1122_s14 = sphi %s1167_s14, %s1432_s14   ;;  %s1118_s13 = sphi %s1165_s13, %s1431_s13   ;;  %s1114_s12 = sphi %s1163_s12, %s1430_s12  }
   0x8   : > { %p70_p0 = scmp.ne.s32.totalorder %s1118_s13, %s1114_s12  ;;  %p1197_p1 = scmp.eq.s32.totalorder %s778_s18, 0 }
   0x9   : > { %p1201_p2 = scmp.eq.s32.totalorder %s778_s18, 3  ;;  %p162_p3 = scmp.eq.s32.totalorder %s779_s19, 3 }
   0xa   : > { %p1207_p4 = por %p1197_p1, %p70_p0  ;;  %p780_p5 = scmp.ge.s32.totalorder %s1134_s17, 1 }
   0xb   : > { %p1212_p6 = por %p162_p3, %p70_p0  ;;  %p169_p7 = scmp.lt.s32.totalorder %s1134_s17, 5 }
   0xc   : > { %s1136_s25 = smov [#allocation6]   ;;  %s42_s28 = sadd.s32 1, %s1130_s16 }
   0xd   : > { %s1420_s23 = scalar_select %p1212_p6, 1, 0 }
   0xe   : > { %p1217_p8 = pnand %p780_p5, %p169_p7  ;;  %s187_s26 = sshll.u32 %s1136_s25, 4  ;;  %s188_s26 = int_to_ptr.vmem [resolvable:$true] %s187_s26 }
   0xf   : > { %s1007_s29 = scalar_lea.vmem %s188_s26, 2048  ;;  %p1015_p3 = scmp.lt.s32.totalorder %s188_s26, %s188_s26 }
  0x10   : > { %p927_p9 = pneg %p1217_p8  ;;  %p1008_p12 = scmp.ne.s32.totalorder %s188_s26, %s1007_s29 }
  0x11   : > { %p1016_p5 = scmp.lt.s32.totalorder %s1007_s29, %s1007_s29 }
  0x12   : > { %p1225_p10 = pnand %p927_p9, %p1197_p1 }
  0x13   : > { %p1017_p7 = por %p1016_p5, %p1015_p3 }
  0x14   : > { %p998_p11 = pneg %p1225_p10 }
  0x16   : > { %p1010_p13 = pnand %p1008_p12, %p998_p11 }
  0x18   : > { %p1011_p0 = pneg %p1010_p13 }
  0x1a   : > { %p1018_p6 = pnand %p1017_p7, %p1011_p0 }
  0x1c   : > { %1021 = shalt.err (!%p1018_p6)
}
  0x1d   : > { %s1414_s30 = smov 128   ;;  %s1415_s4 = smov 8  }
  0x1e   : > { %930 = dma.hbm_to_vmem [thread:$0]  (!%p1225_p10), %s1411_s1, 2048, %s188_s26, [#allocation7], %s1414_s30, %s1414_s30, %s1415_s4  }
  0x1f   : > { %p44_p6 = scmp.ge.s32.totalorder %s42_s28, 4  ;;  %s57_s7 = sadd.s32 1, %s1122_s14 }
  0x20   : > { %p64_p9 = scmp.ne.s32.totalorder %s1122_s14, %s1118_s13  ;;  %p65_p11 = scmp.eq.s32.totalorder %s1134_s17, 0 }
  0x21   : > { %s1436_s28 = smov (%p44_p6, %s42_s28), 0  ;;  %p940_p0 = scmp.lt.s32.totalorder %s1134_s17, 4 }
  0x22   : > { %p1246_p12 = por %p65_p11, %p64_p9  ;;  %p1252_p13 = por %p1201_p2, %p64_p9 }
  0x23   : > { %s51_s10 = ssub.s32 %s1130_s16, %s1436_s28  ;;  %s210_s11 = sand.u32 1, %s1122_s14  }
  0x24   : > { %s1424_s9 = scalar_select %p1252_p13, 1, 0 }
  0x25   : > { %p55_p10 = scmp.eq.s32.totalorder %s51_s10, 0  ;;  %s784_s18 = sshll.u32 %s210_s11, 7 }
  0x26   : > { %s797_s25 = sshll.u32 %s1130_s16, 11  ;;  %s214_s5 = scalar_lea.vmem [#allocation3], %s784_s18 }
  0x27   : > { %s1261_s19 = scalar_select %p55_p10, %s1122_s14, %s57_s7  }
  0x28   : > { %s223_s29 = scalar_lea.hbm %s1410_s0, %s797_s25  ;;  %s224_s6 = sshll.u32 %s214_s5, 4  ;;  %s225_s6 = int_to_ptr.vmem [resolvable:$true] %s224_s6 }
  0x29   : > { %p1269_p2 = pnand %p940_p0, %p1246_p12  ;;  %s211_s30 = scalar_lea.sflag [#allocation4], %s210_s11 }
  0x2a   : > { %s1035_s10 = scalar_lea.vmem %s225_s6, 2048  ;;  %s1139_s7 = smov [#allocation3]  }
  0x2b   : > { %p1024_p3 = pneg %p1269_p2  ;;  %p1036_p5 = scmp.ne.s32.totalorder %s225_s6, %s1035_s10 }
  0x2c   : > { %s1040_s4 = sshll.u32 %s1139_s7, 4  ;;  %s1041_s4 = int_to_ptr.vmem [resolvable:$false] %s1040_s4 }
  0x2d   : > { %p1038_p7 = pnand %p1036_p5, %p1024_p3  ;;  %s1042_s25 = scalar_lea.vmem %s1041_s4, 4096 }
  0x2e   : > { %p1043_p9 = scmp.lt.s32.totalorder %s225_s6, %s1041_s4  ;;  %p1044_p11 = scmp.lt.s32.totalorder %s1042_s25, %s1035_s10 }
  0x2f   : > { %p1039_p6 = pneg %p1038_p7 }
  0x30   : > { %p1045_p10 = por %p1044_p11, %p1043_p9 }
  0x32   : > { %p1046_p13 = pnand %p1045_p10, %p1039_p6 }
  0x34   : > { %1049 = shalt.err (!%p1046_p13)
}
  0x35   : > { %s1426_s8 = smov 8   ;;  %s1427_s18 = smov 128  }
  0x36   : > { %934 = dma.hbm_to_vmem [thread:$0]  (!%p1269_p2), %s223_s29, 2048, %s225_s6, %s211_s30, %s1427_s18, %s1427_s18, %s1426_s8  }
  0x37   : > { %236 = sbr.rel (%p1217_p8) target bundleno = 324 (0x144), region = 32  ;;  %s1283_s11 = sand.u32 (!%p1217_p8), 1, %s1118_s13  }
  0x38   : > { %s788_s4 = sshll.u32 (!%p1217_p8), %s1283_s11, 7  ;;  %s239_s26 = scalar_lea.sflag (!%p1217_p8), [#allocation4], %s1283_s11 }
  0x39   : > { %s1289_s27 = scalar_lea.vmem (!%p1217_p8), [#allocation3], %s788_s4 }
  0x3c   : > { %1101 = dma.done.wait (%p1207_p4), %s239_s26, 2048  }
  0x3d   : > { %1103 = vsyncadd (%p1207_p4), %s239_s26, 4294965248 }
  0x3e   : > { %1105 = dma.done.wait (%p1197_p1), [#allocation7], 2048  }
  0x3f   : > { %1107 = vsyncadd (%p1197_p1), [#allocation7], 4294965248  ;;  %v351_v0 = vld [vmem:[#allocation6 + $0x78] sm:$0xff]  ;;  %v350_v1 = vld [vmem:[#allocation6 + $0x70] sm:$0xff]  ;;  %s1328_s24 = scalar_lea.vmem [#allocation8], %s788_s4  ;;  %s798_s30 = sshll.u32 %s1126_s15, 11 }
  0x40   : > { %831 = vmatprep.subr.mxu0 %v351_v0  ;;  %887 = vmatprep.subr.mxu1 %v351_v0  ;;  %v349_v2 = vld [vmem:[#allocation6 + $0x68] sm:$0xff]  ;;  %v348_v3 = vld [vmem:[#allocation6 + $0x60] sm:$0xff]  ;;  %v347_v4 = vld [vmem:[#allocation6 + $0x58] sm:$0xff]  ;;  %s652_s29 = sshll.u32 %s1328_s24, 4  ;;  %s1359_s6 = scalar_lea.hbm %s1413_s3, %s798_s30  ;;  %s1361_s29 = int_to_ptr.vmem [resolvable:$true] %s652_s29 }
  0x41   : > { %832 = vmatpush3.msra.mxu0 %v351_v0  ;;  %903 = vmatpush3.msra.mxu1 %v351_v0  ;;  %v346_v5 = vld [vmem:[#allocation6 + $0x50] sm:$0xff]  ;;  %v345_v6 = vld [vmem:[#allocation6 + $0x48] sm:$0xff]  ;;  %v344_v7 = vld [vmem:[#allocation6 + $0x40] sm:$0xff]  ;;  %s636_s21 = scalar_lea.sflag [#allocation5], %s1283_s11  ;;  %s1050_s10 = scalar_lea.vmem %s1361_s29, 2048 }
  0x42   : > { %833 = vmatprep.subr.mxu0 %v350_v1  ;;  %888 = vmatprep.subr.mxu1 %v350_v1  ;;  %v343_v8 = vld [vmem:[#allocation6 + $0x38] sm:$0xff]  ;;  %v342_v9 = vld [vmem:[#allocation6 + $0x30] sm:$0xff]  ;;  %v341_v10 = vld [vmem:[#allocation6 + $0x28] sm:$0xff]  ;;  %p1051_p1 = scmp.ne.s32.totalorder %s1361_s29, %s1050_s10  ;;  %p1428_p4 = scmp.ne.s32.totalorder %s1424_s9, 0 }
  0x43   : > { %834 = vmatpush3.msra.mxu0 %v350_v1  ;;  %904 = vmatpush3.msra.mxu1 %v350_v1  ;;  %v340_v11 = vld [vmem:[#allocation6 + $0x20] sm:$0xff]  ;;  %v339_v12 = vld [vmem:[#allocation6 + $0x18] sm:$0xff]  ;;  %v338_v13 = vld [vmem:[#allocation6 + $0x10] sm:$0xff]  ;;  %s1140_s7 = smov [#allocation8]  }
  0x44   : > { %835 = vmatprep.subr.mxu0 %v349_v2  ;;  %889 = vmatprep.subr.mxu1 %v349_v2  ;;  %v337_v14 = vld [vmem:[#allocation6 + $0x8] sm:$0xff]  ;;  %v336_v15 = vld [vmem:[#allocation6] sm:$0xff]  ;;  %v322_v20 = vld [vmem:[%s1289_s27 + $0x10] sm:$0xff]  ;;  %p1052_p8 = pnand %p1051_p1, %p1428_p4  ;;  %s1054_s25 = sshll.u32 %s1140_s7, 4  ;;  %s1055_s25 = int_to_ptr.vmem [resolvable:$false] %s1054_s25 }
  0x45   : > { %836 = vmatpush3.msra.mxu0 %v349_v2  ;;  %905 = vmatpush3.msra.mxu1 %v349_v2  ;;  %v320_v16 = vld [vmem:[%s1289_s27] sm:$0xff]  ;;  %v321_v18 = vld [vmem:[%s1289_s27 + $0x8] sm:$0xff]  ;;  %v330_v21 = vld [vmem:[%s1289_s27 + $0x50] sm:$0xff]  ;;  %s1056_s8 = scalar_lea.vmem %s1055_s25, 4096  ;;  %p1057_p13 = scmp.lt.s32.totalorder %s1361_s29, %s1055_s25 }
  0x46   : > { %837 = vmatprep.subr.mxu0 %v348_v3  ;;  %890 = vmatprep.subr.mxu1 %v348_v3  ;;  %v328_v17 = vld [vmem:[%s1289_s27 + $0x40] sm:$0xff]  ;;  %v329_v19 = vld [vmem:[%s1289_s27 + $0x48] sm:$0xff]  ;;  %v323_v22 = vld [vmem:[%s1289_s27 + $0x18] sm:$0xff]  ;;  %p1053_p12 = pneg %p1052_p8  ;;  %p1058_p0 = scmp.lt.s32.totalorder %s1056_s8, %s1050_s10 }
  0x47   : > { %838 = vmatpush3.msra.mxu0 %v348_v3  ;;  %906 = vmatpush3.msra.mxu1 %v348_v3  ;;  %v331_v23 = vld [vmem:[%s1289_s27 + $0x58] sm:$0xff]  ;;  %v324_v24 = vld [vmem:[%s1289_s27 + $0x20] sm:$0xff]  ;;  %v325_v26 = vld [vmem:[%s1289_s27 + $0x28] sm:$0xff] }
  0x48   : > { %839 = vmatprep.subr.mxu0 %v347_v4  ;;  %891 = vmatprep.subr.mxu1 %v347_v4  ;;  %v332_v25 = vld [vmem:[%s1289_s27 + $0x60] sm:$0xff]  ;;  %v333_v27 = vld [vmem:[%s1289_s27 + $0x68] sm:$0xff]  ;;  %v326_v28 = vld [vmem:[%s1289_s27 + $0x30] sm:$0xff]  ;;  %p1059_p2 = por %p1058_p0, %p1057_p13 }
  0x49   : > { %840 = vmatpush3.msra.mxu0 %v347_v4  ;;  %907 = vmatpush3.msra.mxu1 %v347_v4  ;;  %v334_v29 = vld [vmem:[%s1289_s27 + $0x70] sm:$0xff]  ;;  %v327_v30 = vld [vmem:[%s1289_s27 + $0x38] sm:$0xff]  ;;  %v1318_v32 = vld [vmem:[%s1412_s2] ss:$0 sm:$0xff] }
  0x4a   : > { %841 = vmatprep.subr.mxu0 %v346_v5  ;;  %892 = vmatprep.subr.mxu1 %v346_v5  ;;  %v335_v31 = vld [vmem:[%s1289_s27 + $0x78] sm:$0xff]  ;;  %p1060_p3 = pnand %p1059_p2, %p1053_p12 }
  0x4b   : > { %842 = vmatpush3.msra.mxu0 %v346_v5  ;;  %908 = vmatpush3.msra.mxu1 %v346_v5 }
  0x4c   : > { %843 = vmatprep.subr.mxu0 %v345_v6  ;;  %893 = vmatprep.subr.mxu1 %v345_v6 }
  0x4d   : > { %844 = vmatpush3.msra.mxu0 %v345_v6  ;;  %909 = vmatpush3.msra.mxu1 %v345_v6 }
  0x4e   : > { %845 = vmatprep.subr.mxu0 %v344_v7  ;;  %894 = vmatprep.subr.mxu1 %v344_v7 }
  0x4f   : > { %846 = vmatpush3.msra.mxu0 %v344_v7  ;;  %910 = vmatpush3.msra.mxu1 %v344_v7 }
  0x50   : > { %847 = vmatprep.subr.mxu0 %v343_v8  ;;  %895 = vmatprep.subr.mxu1 %v343_v8 }
  0x51   : > { %848 = vmatpush3.msra.mxu0 %v343_v8  ;;  %911 = vmatpush3.msra.mxu1 %v343_v8 }
  0x52   : > { %849 = vmatprep.subr.mxu0 %v342_v9  ;;  %896 = vmatprep.subr.mxu1 %v342_v9 }
  0x53   : > { %850 = vmatpush3.msra.mxu0 %v342_v9  ;;  %912 = vmatpush3.msra.mxu1 %v342_v9 }
  0x54   : > { %851 = vmatprep.subr.mxu0 %v341_v10  ;;  %897 = vmatprep.subr.mxu1 %v341_v10 }
  0x55   : > { %852 = vmatpush3.msra.mxu0 %v341_v10  ;;  %913 = vmatpush3.msra.mxu1 %v341_v10 }
  0x56   : > { %853 = vmatprep.subr.mxu0 %v340_v11  ;;  %898 = vmatprep.subr.mxu1 %v340_v11 }
  0x57   : > { %854 = vmatpush3.msra.mxu0 %v340_v11  ;;  %914 = vmatpush3.msra.mxu1 %v340_v11 }
  0x58   : > { %855 = vmatprep.subr.mxu0 %v339_v12  ;;  %899 = vmatprep.subr.mxu1 %v339_v12 }
  0x59   : > { %856 = vmatpush3.msra.mxu0 %v339_v12  ;;  %915 = vmatpush3.msra.mxu1 %v339_v12 }
  0x5a   : > { %857 = vmatprep.subr.mxu0 %v338_v13  ;;  %900 = vmatprep.subr.mxu1 %v338_v13 }
  0x5b   : > { %858 = vmatpush3.msra.mxu0 %v338_v13  ;;  %916 = vmatpush3.msra.mxu1 %v338_v13 }
  0x5c   : > { %859 = vmatprep.subr.mxu0 %v337_v14  ;;  %901 = vmatprep.subr.mxu1 %v337_v14 }
  0x5d   : > { %860 = vmatpush3.msra.mxu0 %v337_v14  ;;  %917 = vmatpush3.msra.mxu1 %v337_v14 }
  0x5e   : > { %861 = vmatprep.subr.mxu0 %v336_v15  ;;  %902 = vmatprep.subr.mxu1 %v336_v15 }
  0x5f   : > { %862 = vmatpush3.msra.mxu0 %v336_v15  ;;  %918 = vmatpush3.msra.mxu1 %v336_v15 }
  0x60   : > { %863 = vmatprep.mubr.f32.mxu0 %v320_v16  ;;  %875 = vmatprep.mubr.f32.mxu1 %v328_v17 }
  0x61   : > { %864 = vmatmul.mubr.f32.vlgmr.msra.gmra.mxu0 %v321_v18  ;;  %876 = vmatmul.mubr.f32.vlgmr.msra.gmra.mxu1 %v329_v19 }
  0x62   : > { %866 = vmatprep.mubr.f32.mxu0 %v322_v20  ;;  %878 = vmatprep.mubr.f32.mxu1 %v330_v21 }
  0x65   : > { %867 = vmatmul.mubr.f32.gmra.mxu0 %v323_v22  ;;  %879 = vmatmul.mubr.f32.gmra.mxu1 %v331_v23 }
  0x66   : > { %869 = vmatprep.mubr.f32.mxu0 %v324_v24  ;;  %881 = vmatprep.mubr.f32.mxu1 %v332_v25 }
  0x69   : > { %870 = vmatmul.mubr.f32.gmra.mxu0 %v325_v26  ;;  %882 = vmatmul.mubr.f32.gmra.mxu1 %v333_v27 }
  0x6a   : > { %872 = vmatprep.mubr.f32.mxu0 %v326_v28  ;;  %884 = vmatprep.mubr.f32.mxu1 %v334_v29 }
  0x6d   : > { %873 = vmatmul.mubr.f32.gmra.mxu0 %v327_v30  ;;  %885 = vmatmul.mubr.f32.gmra.mxu1 %v335_v31 }
 0x121   : > { %v865_v33 = vpop.f32.mrf.mxu0  ;;  %v877_v34 = vpop.f32.mrf.mxu1 }
 0x122   : > { %v556_v35 = vadd.f32 %v865_v33, %v1318_v32  ;;  %v564_v36 = vadd.f32 %v877_v34, %v1318_v32 }
 0x123   : > { %v418_v37 = vpop.f32.mrf.mxu0  ;;  %v458_v38 = vpop.f32.mrf.mxu1 }
 0x124   : > { %vm572_vm0 = vcmp.ge.f32.partialorder %v556_v35, 0.0  ;;  %v588_v39 = vmul.f32 0.1, %v556_v35  ;;  %vm580_vm1 = vcmp.ge.f32.partialorder %v564_v36, 0.0  ;;  %v596_v40 = vmul.f32 0.1, %v564_v36 }
 0x125   : > { %v555_v41 = vadd.f32 %v1318_v32, %v418_v37  ;;  %v563_v42 = vadd.f32 %v1318_v32, %v458_v38  ;;  %v868_v43 = vpop.f32.mrf.mxu0  ;;  %v880_v44 = vpop.f32.mrf.mxu1 }
 0x126   : > { %v604_v45 = vsel %vm572_vm0, %v556_v35, %v588_v39  ;;  %v612_v46 = vsel %vm580_vm1, %v564_v36, %v596_v40  ;;  %v558_v47 = vadd.f32 %v868_v43, %v1318_v32  ;;  %v566_v48 = vadd.f32 %v880_v44, %v1318_v32 }
 0x127   : > { %620 = vst [vmem:[%s1328_s24 + $0x8] sm:$0xff] %v604_v45  ;;  %628 = vst [vmem:[%s1328_s24 + $0x48] sm:$0xff] %v612_v46  ;;  %vm571_vm2 = vcmp.ge.f32.partialorder %v555_v41, 0.0  ;;  %v587_v49 = vmul.f32 0.1, %v555_v41  ;;  %vm579_vm3 = vcmp.ge.f32.partialorder %v563_v42, 0.0  ;;  %v428_v51 = vpop.f32.mrf.mxu0  ;;  %v468_v52 = vpop.f32.mrf.mxu1 }
 0x128   : > { %v595_v50 = vmul.f32 0.1, %v563_v42  ;;  %vm574_vm4 = vcmp.ge.f32.partialorder %v558_v47, 0.0  ;;  %v590_v53 = vmul.f32 0.1, %v558_v47  ;;  %vm582_vm5 = vcmp.ge.f32.partialorder %v566_v48, 0.0 }
 0x129   : > { %v598_v54 = vmul.f32 0.1, %v566_v48  ;;  %v603_v55 = vsel %vm571_vm2, %v555_v41, %v587_v49  ;;  %v557_v57 = vadd.f32 %v1318_v32, %v428_v51  ;;  %v565_v58 = vadd.f32 %v1318_v32, %v468_v52  ;;  %v871_v59 = vpop.f32.mrf.mxu0  ;;  %v883_v60 = vpop.f32.mrf.mxu1 }
 0x12a   : > { %v611_v56 = vsel %vm579_vm3, %v563_v42, %v595_v50  ;;  %619 = vst [vmem:[%s1328_s24] sm:$0xff] %v603_v55  ;;  %v606_v61 = vsel %vm574_vm4, %v558_v47, %v590_v53  ;;  %v560_v63 = vadd.f32 %v871_v59, %v1318_v32  ;;  %v568_v0 = vadd.f32 %v883_v60, %v1318_v32 }
 0x12b   : > { %627 = vst [vmem:[%s1328_s24 + $0x40] sm:$0xff] %v611_v56  ;;  %v614_v62 = vsel %vm582_vm5, %v566_v48, %v598_v54  ;;  %622 = vst [vmem:[%s1328_s24 + $0x18] sm:$0xff] %v606_v61  ;;  %vm573_vm6 = vcmp.ge.f32.partialorder %v557_v57, 0.0  ;;  %v589_v1 = vmul.f32 0.1, %v557_v57  ;;  %vm581_vm7 = vcmp.ge.f32.partialorder %v565_v58, 0.0  ;;  %v438_v3 = vpop.f32.mrf.mxu0  ;;  %v478_v4 = vpop.f32.mrf.mxu1 }
 0x12c   : > { %630 = vst [vmem:[%s1328_s24 + $0x58] sm:$0xff] %v614_v62  ;;  %v597_v2 = vmul.f32 0.1, %v565_v58  ;;  %vm576_vm8 = vcmp.ge.f32.partialorder %v560_v63, 0.0  ;;  %v592_v5 = vmul.f32 0.1, %v560_v63  ;;  %v559_v9 = vadd.f32 %v1318_v32, %v438_v3 }
 0x12d   : > { %vm584_vm9 = vcmp.ge.f32.partialorder %v568_v0, 0.0  ;;  %v600_v6 = vmul.f32 0.1, %v568_v0  ;;  %v605_v7 = vsel %vm573_vm6, %v557_v57, %v589_v1  ;;  %v567_v10 = vadd.f32 %v1318_v32, %v478_v4  ;;  %v874_v11 = vpop.f32.mrf.mxu0  ;;  %v886_v12 = vpop.f32.mrf.mxu1 }
 0x12e   : > { %v613_v8 = vsel %vm581_vm7, %v565_v58, %v597_v2  ;;  %621 = vst [vmem:[%s1328_s24 + $0x10] sm:$0xff] %v605_v7  ;;  %v608_v13 = vsel %vm576_vm8, %v560_v63, %v592_v5  ;;  %v562_v15 = vadd.f32 %v874_v11, %v1318_v32  ;;  %v570_v16 = vadd.f32 %v886_v12, %v1318_v32 }
 0x12f   : > { %629 = vst [vmem:[%s1328_s24 + $0x50] sm:$0xff] %v613_v8  ;;  %v616_v14 = vsel %vm584_vm9, %v568_v0, %v600_v6  ;;  %624 = vst [vmem:[%s1328_s24 + $0x28] sm:$0xff] %v608_v13  ;;  %vm575_vm10 = vcmp.ge.f32.partialorder %v559_v9, 0.0  ;;  %v591_v17 = vmul.f32 0.1, %v559_v9  ;;  %vm583_vm11 = vcmp.ge.f32.partialorder %v567_v10, 0.0  ;;  %v448_v19 = vpop.f32.mrf.mxu0  ;;  %v488_v20 = vpop.f32.mrf.mxu1 }
 0x130   : > { %632 = vst [vmem:[%s1328_s24 + $0x68] sm:$0xff] %v616_v14  ;;  %v599_v18 = vmul.f32 0.1, %v567_v10  ;;  %vm578_vm12 = vcmp.ge.f32.partialorder %v562_v15, 0.0  ;;  %v594_v21 = vmul.f32 0.1, %v562_v15  ;;  %v561_v25 = vadd.f32 %v1318_v32, %v448_v19 }
 0x131   : > { %vm586_vm13 = vcmp.ge.f32.partialorder %v570_v16, 0.0  ;;  %v602_v22 = vmul.f32 0.1, %v570_v16  ;;  %v607_v23 = vsel %vm575_vm10, %v559_v9, %v591_v17  ;;  %v569_v26 = vadd.f32 %v1318_v32, %v488_v20 }
 0x132   : > { %v615_v24 = vsel %vm583_vm11, %v567_v10, %v599_v18  ;;  %623 = vst [vmem:[%s1328_s24 + $0x20] sm:$0xff] %v607_v23  ;;  %v610_v27 = vsel %vm578_vm12, %v562_v15, %v594_v21  ;;  %vm577_vm14 = vcmp.ge.f32.partialorder %v561_v25, 0.0  ;;  %v593_v29 = vmul.f32 0.1, %v561_v25 }
 0x133   : > { %631 = vst [vmem:[%s1328_s24 + $0x60] sm:$0xff] %v615_v24  ;;  %v618_v28 = vsel %vm586_vm13, %v570_v16, %v602_v22  ;;  %626 = vst [vmem:[%s1328_s24 + $0x38] sm:$0xff] %v610_v27  ;;  %vm585_vm15 = vcmp.ge.f32.partialorder %v569_v26, 0.0  ;;  %v601_v30 = vmul.f32 0.1, %v569_v26 }
 0x134   : > { %634 = vst [vmem:[%s1328_s24 + $0x78] sm:$0xff] %v618_v28  ;;  %v609_v31 = vsel %vm577_vm14, %v561_v25, %v593_v29 }
 0x135   : > { %v617_v32 = vsel %vm585_vm15, %v569_v26, %v601_v30  ;;  %625 = vst [vmem:[%s1328_s24 + $0x30] sm:$0xff] %v609_v31 }
 0x136   : > { %633 = vst [vmem:[%s1328_s24 + $0x70] sm:$0xff] %v617_v32 }
 0x137   : > { %1063 = shalt.err (!%p1060_p3)
}
 0x138   : > { %s1064_s18 = scalar_lea.hbm %s1359_s6, 2048  ;;  %s1068_s27 = scalar_lea.hbm %s1413_s3, 8192 }
 0x139   : > { %p1065_p5 = scmp.ne.s32.totalorder %s1359_s6, %s1064_s18  ;;  %p1069_p9 = scmp.lt.s32.totalorder %s1359_s6, %s1413_s3 }
 0x13a   : > { %p1070_p11 = scmp.lt.s32.totalorder %s1068_s27, %s1064_s18 }
 0x13b   : > { %p1066_p7 = pnand %p1065_p5, %p1428_p4 }
 0x13c   : > { %p1071_p10 = por %p1070_p11, %p1069_p9 }
 0x13d   : > { %p1067_p6 = pneg %p1066_p7 }
 0x13f   : > { %p1072_p1 = pnand %p1071_p10, %p1067_p6 }
 0x141   : > { %1075 = shalt.err (!%p1072_p1)
}
 0x142   : > { %s1141_s24 = smov 128   ;;  %s1142_s30 = smov 8  }
 0x143   : > { %925 = dma.vmem_to_hbm [thread:$0]  (%p1428_p4), %s1361_s29, 2048, %s1359_s6, %s636_s21, %s1141_s24, %s1141_s24, %s1142_s30  }
 0x144 PF: > { %p942_p8 = scmp.ge.s32.totalorder %s1134_s17, 2  ;;  %s667_s15 = sand.u32 1, %s1114_s12  }
 0x145   : > { %p1429_p12 = scmp.ne.s32.totalorder %s1420_s23, 0  ;;  %s668_s5 = scalar_lea.sflag [#allocation5], %s667_s15 }
 0x147   : > { %p936_p13 = pnand %p942_p8, %p1429_p12 }
 0x149   : > { %p937_p0 = pneg %p936_p13 }
 0x14b   : > { %1109 = dma.done.wait (%p937_p0), %s668_s5, 2048  }
 0x14c   : > { %1111 = vsyncadd (%p937_p0), %s668_s5, 4294965248  ;;  %s20_s17 = sadd.s32 1, %s1134_s17   ;;  %s1430_s12 = smov %s1118_s13 }
 0x14d   : > { %p17_p2 = scmp.ge.s32.totalorder %s20_s17, 6   ;;  %s1431_s13 = smov %s1122_s14 }
 0x14e   : > { %s1432_s14 = smov %s1261_s19  ;;  %s1433_s15 = smov %s1130_s16 }
 0x14f   : > { %s1434_s16 = smov %s1436_s28  ;;  %19 = sbr.rel (!%p17_p2) target bundleno = 7 (0x7), region = 93 }
 0x154   :  { %673 = vsyncpa [#allocation4], 1 }
 0x155   :  { %675 = vsyncpa [#allocation4 + $0x1], 1 }
 0x156   :  { %676 = vsyncpa [#allocation7], 1 }
 0x157   :  { %677 = vsyncpa [#allocation5], 1 }
 0x158   :  { %679 = vsyncpa [#allocation5 + $0x1], 1 }

</bundles_post_ra>
